<compile_context>
chip_gen: v6e
topology: v6e:2x2x1
jax: 0.10.0
libtpu: 0.0.40
codegen_flags: <defaults>
</compile_context>

<pallas_src>
import jax
import jax.numpy as jnp
from jax import lax
from jax.experimental import pallas as pl
from jax.experimental.pallas import tpu as pltpu


def _round_up(x, m):
    return ((x + m - 1) // m) * m


def _vmem_capacity_bytes():
    try:
        cap = getattr(pltpu.get_tpu_info(), "vmem_capacity_bytes", None)
        if cap:
            return int(cap)
    except Exception:
        pass
    return 64 * 1024 * 1024  # conservative default (v7x per-TC VMEM)


_ONEHOT_V_TILE = 512  # vocab-axis chunk size for the one-hot matmul


# ---------------------------------------------------------------------------
# Path 1: table resident in VMEM, gather as K-tiled one-hot MXU matmul.
# ---------------------------------------------------------------------------
def _onehot_gather_kernel(idx_ref, table_ref, out_ref, acc_ref):
    # idx_ref:   (B, 1) int32 block of indices (VMEM)
    # table_ref: (num_nodes, h_dim) full embedding table, resident in VMEM
    # out_ref:   (B, h_dim) output block
    # acc_ref:   (B, h_dim) f32 accumulator scratch
    b_rows = out_ref.shape[0]
    num_nodes = table_ref.shape[0]
    idx_col = idx_ref[...]                                   # (B, 1) int32
    v_tile = min(_ONEHOT_V_TILE, num_nodes)

    # K-tile over the vocab axis so the (B, V) one-hot temporaries stay small
    # (static Python loop: chunk starts/sizes are compile-time constants).
    first = True
    for start in range(0, num_nodes, v_tile):
        size = min(v_tile, num_nodes - start)
        node_ids = lax.broadcasted_iota(jnp.int32, (b_rows, size), 1) + start
        onehot = (idx_col == node_ids).astype(table_ref.dtype)      # exact 0/1
        part = jnp.dot(onehot, table_ref[start:start + size, :],
                       preferred_element_type=jnp.float32)
        if first:
            acc_ref[...] = part
            first = False
        else:
            acc_ref[...] += part
    out_ref[...] = acc_ref[...].astype(out_ref.dtype)


def _gather_onehot(table, idx_pad, block_rows, vmem_limit):
    num_nodes, h_dim = table.shape
    n_pad = idx_pad.shape[0]
    grid = (n_pad // block_rows,)
    idx2d = idx_pad.reshape(n_pad, 1)
    dt_bytes = jnp.dtype(table.dtype).itemsize

    cost = pl.CostEstimate(
        flops=2 * n_pad * num_nodes * h_dim,
        transcendentals=0,
        bytes_accessed=num_nodes * h_dim * dt_bytes
        + n_pad * h_dim * dt_bytes
        + n_pad * 4,
    )

    grid_spec = pltpu.PrefetchScalarGridSpec(
        num_scalar_prefetch=0,
        grid=grid,
        in_specs=[
            pl.BlockSpec((block_rows, 1), lambda i: (i, 0)),       # indices
            # Full table with a constant block index: streamed from HBM once,
            # then resident in VMEM for all grid steps.
            pl.BlockSpec((num_nodes, h_dim), lambda i: (0, 0)),
        ],
        out_specs=pl.BlockSpec((block_rows, h_dim), lambda i: (i, 0)),
        scratch_shapes=[pltpu.VMEM((block_rows, h_dim), jnp.float32)],
    )

    return pl.pallas_call(
        _onehot_gather_kernel,
        grid_spec=grid_spec,
        out_shape=jax.ShapeDtypeStruct((n_pad, h_dim), table.dtype),
        compiler_params=pltpu.CompilerParams(
            dimension_semantics=("parallel",),   # independent output blocks
            vmem_limit_bytes=vmem_limit,
        ),
        cost_estimate=cost,
    )(idx2d, table)


# ---------------------------------------------------------------------------
# Path 2: table in HBM; batched row DMAs with cross-step prefetch.
# ---------------------------------------------------------------------------
def _dma_gather_kernel(idx_ref, table_hbm, out_ref, buf, sems):
    # idx_ref:   (n_pad,) int32, scalar-prefetched into SMEM
    # table_hbm: (num_nodes, h_dim) raw HBM ref (memory_space=pl.ANY)
    # out_ref:   (B, h_dim) output block (VMEM)
    # buf:       (2*B, h_dim) VMEM landing buffer: two B-row slots
    # sems:      (2,) DMA semaphores, one per slot
    b_rows = out_ref.shape[0]
    step = pl.program_id(0)
    nsteps = pl.num_programs(0)
    slot = step & 1

    def issue_block(block_idx, dst_slot):
        base = block_idx * b_rows
        dst_base = dst_slot * b_rows

        def issue_one(i, carry):
            row = idx_ref[base + i]
            pltpu.make_async_copy(
                table_hbm.at[pl.ds(row, 1), :],
                buf.at[pl.ds(dst_base + i, 1), :],
                sems.at[dst_slot],
            ).start()
            return carry

        # Fully unrolled so the scheduler can pack descriptor issues
        # back-to-back (non-unrolled visible loops cost ~35%).
        lax.fori_loop(0, b_rows, issue_one, 0, unroll=True)

    # Prime the pipeline: first step fetches its own block.
    @pl.when(step == 0)
    def _():
        issue_block(0, 0)

    # Cross-step prefetch: issue the NEXT block's row DMAs into the other slot
    # before draining this one, hiding HBM gather latency behind this step's
    # drain/copy and the previous block's output writeback.
    @pl.when(step + 1 < nsteps)
    def _():
        issue_block(step + 1, 1 - slot)

    src_off = pl.multiple_of(slot * b_rows, b_rows)
    # Single drain: the DMA semaphore counts bytes, so one wait whose
    # descriptor covers the whole (B, h_dim) slot drains all B row copies.
    pltpu.make_async_copy(
        out_ref, buf.at[pl.ds(src_off, b_rows), :], sems.at[slot]
    ).wait()

    # Copy retained on purpose: prefetched rows must land in scratch that
    # persists across grid steps (a future step's out_ref is not addressable).
    out_ref[...] = buf[pl.ds(src_off, b_rows), :]


def _gather_dma(table, idx_pad, block_rows, vmem_limit):
    num_nodes, h_dim = table.shape
    n_pad = idx_pad.shape[0]
    grid = (n_pad // block_rows,)
    dt_bytes = jnp.dtype(table.dtype).itemsize

    cost = pl.CostEstimate(
        flops=0,
        transcendentals=0,
        bytes_accessed=2 * n_pad * h_dim * dt_bytes + n_pad * 4,
    )

    grid_spec = pltpu.PrefetchScalarGridSpec(
        num_scalar_prefetch=1,                          # indices -> SMEM
        grid=grid,
        in_specs=[pl.BlockSpec(memory_space=pl.ANY)],   # table stays in HBM
        out_specs=pl.BlockSpec((block_rows, h_dim), lambda i, idx: (i, 0)),
        scratch_shapes=[
            pltpu.VMEM((2 * block_rows, h_dim), table.dtype),   # 2 slots
            pltpu.SemaphoreType.DMA((2,)),                      # 1 sem / slot
        ],
    )

    return pl.pallas_call(
        _dma_gather_kernel,
        grid_spec=grid_spec,
        out_shape=jax.ShapeDtypeStruct((n_pad, h_dim), table.dtype),
        compiler_params=pltpu.CompilerParams(
            # Cross-step prefetch keeps DMA state in scratch across iterations
            # and primes at step 0, so the axis must run in order on one core.
            dimension_semantics=("arbitrary",),
            vmem_limit_bytes=vmem_limit,
        ),
        cost_estimate=cost,
    )(idx_pad, table)


# ---------------------------------------------------------------------------
# Dispatch wrapper (matches EmbeddingLayer.forward semantics).
# ---------------------------------------------------------------------------
def _choose_block_rows(n, requested, path):
    if requested is not None:
        return max(8, _round_up(int(requested), 8))
    if path == "onehot":
        # Align the matmul M dim / output sublane tiling to whole vregs and
        # the 256-wide MXU for large n; tiny n only needs sublane-full blocks.
        if n >= 256:
            return 256
        if n >= 128:
            return 128
        return _round_up(max(n, 8), 8)
    # DMA path: rows in flight per step; modest because the issue loop is
    # fully unrolled (and prefetch already hides per-step latency).
    return min(64, _round_up(max(n, 8), 8))


def embedding_lookup(emb_table, indices, *, block_rows=None, force_path=None):
    """Pallas equivalent of EmbeddingLayer.forward: emb_table[indices.squeeze()]."""
    num_nodes, h_dim = emb_table.shape

    idx_shape = jnp.shape(indices)
    squeezed_shape = tuple(d for d in idx_shape if d != 1)    # torch .squeeze()
    idx = jnp.asarray(indices).reshape(-1).astype(jnp.int32)
    # nn.Embedding raises on out-of-range indices; we clamp instead so a bad
    # index can never steer a DMA outside the table (documented deviation).
    idx = jnp.clip(idx, 0, num_nodes - 1)
    n = int(idx.shape[0])

    vmem_cap = _vmem_capacity_bytes()
    vmem_limit = int(min(vmem_cap * 3 // 4, 96 * 1024 * 1024))
    dt_bytes = jnp.dtype(emb_table.dtype).itemsize
    table_bytes = num_nodes * h_dim * dt_bytes

    b_oh = _choose_block_rows(n, block_rows, "onehot")
    v_tile = min(_ONEHOT_V_TILE, num_nodes)
    onehot_need = (
        2 * table_bytes                    # resident table (pipeline 2-buffers)
        + 2 * b_oh * h_dim * dt_bytes      # output block double-buffer
        + b_oh * h_dim * 4                 # f32 accumulator scratch
        + 3 * b_oh * v_tile * 4            # per-chunk iota/compare/one-hot temps
    )
    # One-hot matmul is O(B*V*D): only worth it for modest vocabularies; f32
    # tables hit the slow MXU path (much slower on v5e) -> tighter cap.
    vocab_cap = 2048 if dt_bytes >= 4 else 4096
    # Gate against half the per-core VMEM: with a "parallel" grid each v7x
    # TensorCore keeps its own resident copy of the table.
    use_onehot = (num_nodes <= vocab_cap) and (onehot_need <= vmem_cap // 2)
    if force_path is not None:
        use_onehot = force_path == "onehot"

    b = b_oh if use_onehot else _choose_block_rows(n, block_rows, "dma")
    n_pad = _round_up(n, b)
    if n_pad != n:
        # Padded tail rows gather row 0: correct, small wasted work last block.
        idx = jnp.pad(idx, (0, n_pad - n))

    if use_onehot:
        out = _gather_onehot(emb_table, idx, b, vmem_limit)
    else:
        out = _gather_dma(emb_table, idx, b, vmem_limit)

    return out[:n].reshape(squeezed_shape + (h_dim,))


def embedding_layer_forward(emb_table, g, h, r, norm):
    """Signature-parity wrapper: g, r, norm are unused by the original forward."""
    del g, r, norm
    return embedding_lookup(emb_table, h)


if __name__ == "__main__":
    key = jax.random.PRNGKey(0)
    k_emb, k_idx1, k_tab2, k_idx2 = jax.random.split(key, 4)

    # Config A: small table -> VMEM-resident one-hot path, two 256-row blocks.
    num_nodes, h_dim = 64, 32
    emb_table = jax.random.normal(k_emb, (num_nodes, h_dim), dtype=jnp.float32)
    h = jax.random.randint(k_idx1, (300, 1), 0, num_nodes, dtype=jnp.int32)
    out = jax.block_until_ready(
        embedding_layer_forward(emb_table, None, h, None, None))
    ref = jnp.take(emb_table, jnp.squeeze(h), axis=0)
    assert out.shape == ref.shape and out.dtype == emb_table.dtype
    assert jnp.allclose(out, ref)

    # Config B: force the HBM-resident batched row-DMA path; block_rows=16 on
    # 40 indices gives 3 grid steps, exercising prime + prefetch + final step.
    num_nodes_b, h_dim_b = 128, 128
    table_b = jax.random.normal(k_tab2, (num_nodes_b, h_dim_b), dtype=jnp.float32)
    h_b = jax.random.randint(k_idx2, (40, 1), 0, num_nodes_b, dtype=jnp.int32)
    out_b = jax.block_until_ready(
        embedding_lookup(table_b, h_b, block_rows=16, force_path="dma"))
    ref_b = jnp.take(table_b, jnp.squeeze(h_b), axis=0)
    assert out_b.shape == ref_b.shape
    assert jnp.allclose(out_b, ref_b)

    # Config C: n == 1 degenerate squeeze (scalar index -> (h_dim,) output).
    h_c = jnp.array([[3]], dtype=jnp.int32)
    out_c = jax.block_until_ready(embedding_lookup(emb_table, h_c))
    ref_c = jnp.take(emb_table, jnp.squeeze(h_c), axis=0)
    assert out_c.shape == ref_c.shape
    assert jnp.allclose(out_c, ref_c)

    print("KERNEL_OK")
</pallas_src>

<mosaic_0001>
module attributes {stable_mosaic.version = 11 : i64} {
  func.func @_onehot_gather_kernel(%arg0: i32, %arg1: memref<256x1xi32, #tpu.memory_space<vmem>>, %arg2: memref<64x32xf32, #tpu.memory_space<vmem>>, %arg3: memref<256x32xf32, #tpu.memory_space<vmem>>, %arg4: memref<256x32xf32, #tpu.memory_space<vmem>>) attributes {dimension_semantics = [#tpu.dimension_semantics<parallel>], iteration_bounds = array<i64: 2>, scalar_prefetch = 0 : i64, scratch_operands = 1 : i64, tpu.core_type = #tpu.core_type<tc>, window_params = [{transform_indices = @transform_0, window_bounds = array<i64: 256, 1>}, {pipeline_mode = #tpu.pipeline_mode<synchronous>, transform_indices = @transform_1, window_bounds = array<i64: 64, 32>}, {transform_indices = @transform_2, window_bounds = array<i64: 256, 32>}]} {
    %c0 = arith.constant 0 : index
    %c0_0 = arith.constant 0 : index
    %0 = vector.load %arg1[%c0, %c0_0] : memref<256x1xi32, #tpu.memory_space<vmem>>, vector<256x1xi32>
    %1 = tpu.iota {dimensions = array<i32: 1>} : vector<256x64xi32>
    %c0_i32 = arith.constant 0 : i32
    %2 = vector.broadcast %c0_i32 : i32 to vector<256x64xi32>
    %3 = arith.addi %1, %2 : vector<256x64xi32>
    %4 = vector.broadcast %0 : vector<256x1xi32> to vector<256x64xi32>
    %5 = arith.cmpi eq, %4, %3 : vector<256x64xi32>
    %6 = arith.extui %5 : vector<256x64xi1> to vector<256x64xi32>
    %7 = arith.sitofp %6 : vector<256x64xi32> to vector<256x64xf32>
    %c0_1 = arith.constant 0 : index
    %c0_2 = arith.constant 0 : index
    %8 = vector.load %arg2[%c0_1, %c0_2] : memref<64x32xf32, #tpu.memory_space<vmem>>, vector<64x32xf32>
    %cst = arith.constant dense<0.000000e+00> : vector<256x32xf32>
    %9 = tpu.matmul %7, %8, %cst {dimension_numbers = #tpu.dot_dimension_numbers<[1], [0], [0], [1], [0, 0, 1, 1], [], []>} : vector<256x64xf32>, vector<64x32xf32>, vector<256x32xf32> -> vector<256x32xf32>
    %c0_3 = arith.constant 0 : index
    %c0_4 = arith.constant 0 : index
    %10 = vector.load %arg4[%c0_3, %c0_4] : memref<256x32xf32, #tpu.memory_space<vmem>>, vector<256x32xf32>
    tpu.vector_store %arg4[%c0_3, %c0_4], %9 {strides = array<i32>} : memref<256x32xf32, #tpu.memory_space<vmem>>, vector<256x32xf32>,
    %c0_5 = arith.constant 0 : index
    %c0_6 = arith.constant 0 : index
    %11 = vector.load %arg4[%c0_5, %c0_6] : memref<256x32xf32, #tpu.memory_space<vmem>>, vector<256x32xf32>
    %c0_7 = arith.constant 0 : index
    %c0_8 = arith.constant 0 : index
    %12 = vector.load %arg3[%c0_7, %c0_8] : memref<256x32xf32, #tpu.memory_space<vmem>>, vector<256x32xf32>
    tpu.vector_store %arg3[%c0_7, %c0_8], %11 {strides = array<i32>} : memref<256x32xf32, #tpu.memory_space<vmem>>, vector<256x32xf32>,
    return
  }
  func.func @transform_0(%arg0: i32) -> (i32, i32) {
    %c0_i32 = arith.constant 0 : i32
    %c0_i32_0 = arith.constant 0 : i32
    return %arg0, %c0_i32 : i32, i32
  }
  func.func @transform_1(%arg0: i32) -> (i32, i32) {
    %c0_i32 = arith.constant 0 : i32
    %c0_i32_0 = arith.constant 0 : i32
    %c0_i32_1 = arith.constant 0 : i32
    return %c0_i32, %c0_i32_0 : i32, i32
  }
  func.func @transform_2(%arg0: i32) -> (i32, i32) {
    %c0_i32 = arith.constant 0 : i32
    %c0_i32_0 = arith.constant 0 : i32
    return %arg0, %c0_i32 : i32, i32
  }
}

</mosaic_0001>

<bundles_post_ra>
// kernel: tpu_custom_call.1
= control target key start
LH: loop header
LB: loop body
LE: loop exit
PB: predicated region body
PF: predicated region fallthrough
CT: control target
= control target key end

     0   :  { %s1088_s9 = smov 0   ;;  %s1366_s0 = inlined_call_operand.vmem [shape: s32[512,1], index: 0, kind: input, shape index: {}]   ;;  %s1367_s1 = inlined_call_operand.vmem [shape: f32[64,32], index: 1, kind: input, shape index: {}]   ;;  %s1368_s2 = inlined_call_operand.vmem [shape: f32[512,32], index: 2, kind: output, shape index: {}]  }
   0x1 LB: > { %s856_s10 = sadd.s32 4294967295, %s1069_s9   ;;  %p860_p0 = scmp.ge.s32.totalorder %s1069_s9, 1  ;;  %s1069_s9 = sphi %s1088_s9, %s12_s9  }
   0x2   : > { %p113_p1 = scmp.lt.s32.totalorder %s1069_s9, 3 }
   0x4   : > { %p114_p2 = pnand %p860_p0, %p113_p1 }
   0x5   : > { %s861_s11 = sshll.u32 (!%p114_p2), %s856_s10, 5 }
   0x6   : > { %117 = sbr.rel (%p114_p2) target bundleno = 410 (0x19a), region = 28  ;;  %p136_p3 = scmp.lt.s32.totalorder (!%p114_p2), %s861_s11, 63 }
   0xb   : > { %v380_v0 = vld [vmem:[%s1367_s1 + $0x38] sm:$0xff]  ;;  %v1071_v1 = vmov 0   ;;  %v379_v2 = vld [vmem:[%s1367_s1 + $0x30] sm:$0xff]  ;;  %s1370_s11 = smov (!%p136_p3, %s861_s11), 63  ;;  %v378_v3 = vld [vmem:[%s1367_s1 + $0x28] sm:$0xff]  ;;  %v179_v41 = vlaneseq  ;;  %vm381_vm0 = vcmask 523264  }
   0xc   : > { %1062 = vset.pattern.permute.xlu1 %v1071_v1  ;;  %1061 = vset.pattern.permute.xlu0 %v1071_v1  ;;  %s862_s18 = sshll.u32 %s1370_s11, 3  ;;  %v377_v4 = vld [vmem:[%s1367_s1 + $0x20] sm:$0xff]  ;;  %v376_v7 = vld [vmem:[%s1367_s1 + $0x18] sm:$0xff]  ;;  %v375_v10 = vld [vmem:[%s1367_s1 + $0x10] sm:$0xff]  ;;  %v1072_v45 = vmov 0.0  }
   0xd   : > { %971 = vmatprep.subr.mxu0 %v380_v0  ;;  %1035 = vmatprep.subr.mxu1 %v380_v0  ;;  %s1113_s21 = scalar_lea.vmem %s1366_s0, %s862_s18  ;;  %v374_v13 = vld [vmem:[%s1367_s1 + $0x8] sm:$0xff]  ;;  %v373_v14 = vld [vmem:[%s1367_s1] sm:$0xff]  ;;  %v1162_v42 = vand.u32 127, %v179_v41  ;;  %s1268_s6 = scalar_lea.vmem %s1368_s2, %s862_s18 }
   0xe   : > { %972 = vmatpush3.msra.mxu0 %v380_v0  ;;  %1043 = vmatpush3.msra.mxu1 %v380_v0  ;;  %v148_v5 = vld [vmem:[%s1113_s21 + $0x8] sm:$0xff]  ;;  %v147_v6 = vld [vmem:[%s1113_s21] sm:$0xff]  ;;  %v165_v11 = vld [vmem:[%s1113_s21 + $0x90] sm:$0xff] }
   0xf   : > { %973 = vmatprep.subr.mxu0 %v379_v2  ;;  %1036 = vmatprep.subr.mxu1 %v379_v2  ;;  %v164_v8 = vld [vmem:[%s1113_s21 + $0x88] sm:$0xff]  ;;  %v163_v9 = vld [vmem:[%s1113_s21 + $0x80] sm:$0xff]  ;;  %v149_v12 = vld [vmem:[%s1113_s21 + $0x10] sm:$0xff] }
  0x10   : > { %974 = vmatpush3.msra.mxu0 %v379_v2  ;;  %1044 = vmatpush3.msra.mxu1 %v379_v2  ;;  %v166_v15 = vld [vmem:[%s1113_s21 + $0x98] sm:$0xff]  ;;  %v167_v17 = vld [vmem:[%s1113_s21 + $0xa0] sm:$0xff]  ;;  %v168_v19 = vld [vmem:[%s1113_s21 + $0xa8] sm:$0xff] }
  0x11   : > { %975 = vmatprep.subr.mxu0 %v378_v3  ;;  %1037 = vmatprep.subr.mxu1 %v378_v3  ;;  %v150_v16 = vld [vmem:[%s1113_s21 + $0x18] sm:$0xff]  ;;  %v151_v18 = vld [vmem:[%s1113_s21 + $0x20] sm:$0xff]  ;;  %v152_v20 = vld [vmem:[%s1113_s21 + $0x28] sm:$0xff] }
  0x12   : > { %976 = vmatpush3.msra.mxu0 %v378_v3  ;;  %1045 = vmatpush3.msra.mxu1 %v378_v3  ;;  %v169_v21 = vld [vmem:[%s1113_s21 + $0xb0] sm:$0xff]  ;;  %v170_v23 = vld [vmem:[%s1113_s21 + $0xb8] sm:$0xff]  ;;  %v171_v25 = vld [vmem:[%s1113_s21 + $0xc0] sm:$0xff] }
  0x13   : > { %185 = vperm.xlu1 %1062, %v148_v5   ;;  %182 = vperm.xlu0 %1061, %v147_v6   ;;  %v153_v22 = vld [vmem:[%s1113_s21 + $0x30] sm:$0xff]  ;;  %v154_v24 = vld [vmem:[%s1113_s21 + $0x38] sm:$0xff]  ;;  %v155_v26 = vld [vmem:[%s1113_s21 + $0x40] sm:$0xff] }
  0x14   : > { %977 = vmatprep.subr.mxu0 %v377_v4  ;;  %1038 = vmatprep.subr.mxu1 %v377_v4  ;;  %v172_v27 = vld [vmem:[%s1113_s21 + $0xc8] sm:$0xff]  ;;  %v173_v29 = vld [vmem:[%s1113_s21 + $0xd0] sm:$0xff]  ;;  %v174_v31 = vld [vmem:[%s1113_s21 + $0xd8] sm:$0xff] }
  0x15   : > { %978 = vmatpush3.msra.mxu0 %v377_v4  ;;  %1046 = vmatpush3.msra.mxu1 %v377_v4  ;;  %v156_v28 = vld [vmem:[%s1113_s21 + $0x48] sm:$0xff]  ;;  %v157_v30 = vld [vmem:[%s1113_s21 + $0x50] sm:$0xff]  ;;  %v158_v32 = vld [vmem:[%s1113_s21 + $0x58] sm:$0xff] }
  0x16   : > { %979 = vmatprep.subr.mxu0 %v376_v7  ;;  %1039 = vmatprep.subr.mxu1 %v376_v7  ;;  %v175_v33 = vld [vmem:[%s1113_s21 + $0xe0] sm:$0xff]  ;;  %v176_v35 = vld [vmem:[%s1113_s21 + $0xe8] sm:$0xff]  ;;  %v177_v37 = vld [vmem:[%s1113_s21 + $0xf0] sm:$0xff] }
  0x17   : > { %233 = vperm.xlu1 %1062, %v164_v8   ;;  %230 = vperm.xlu0 %1061, %v163_v9   ;;  %v159_v34 = vld [vmem:[%s1113_s21 + $0x60] sm:$0xff]  ;;  %v160_v36 = vld [vmem:[%s1113_s21 + $0x68] sm:$0xff]  ;;  %v161_v38 = vld [vmem:[%s1113_s21 + $0x70] sm:$0xff] }
  0x18   : > { %980 = vmatpush3.msra.mxu0 %v376_v7  ;;  %1047 = vmatpush3.msra.mxu1 %v376_v7  ;;  %v178_v39 = vld [vmem:[%s1113_s21 + $0xf8] sm:$0xff] }
  0x19   : > { %981 = vmatprep.subr.mxu0 %v375_v10  ;;  %1040 = vmatprep.subr.mxu1 %v375_v10  ;;  %v162_v40 = vld [vmem:[%s1113_s21 + $0x78] sm:$0xff] }
  0x1a   : > { %982 = vmatpush3.msra.mxu0 %v375_v10  ;;  %1048 = vmatpush3.msra.mxu1 %v375_v10 }
  0x1b   : > { %236 = vperm.xlu1 %1062, %v165_v11   ;;  %188 = vperm.xlu0 %1061, %v149_v12  }
  0x1c   : > { %983 = vmatprep.subr.mxu0 %v374_v13  ;;  %1041 = vmatprep.subr.mxu1 %v374_v13 }
  0x1d   : > { %984 = vmatpush3.msra.mxu0 %v374_v13  ;;  %1049 = vmatpush3.msra.mxu1 %v374_v13 }
  0x1e   : > { %985 = vmatprep.subr.mxu0 %v373_v14  ;;  %1042 = vmatprep.subr.mxu1 %v373_v14 }
  0x1f   : > { %239 = vperm.xlu1 %1062, %v166_v15   ;;  %191 = vperm.xlu0 %1061, %v150_v16  }
  0x20   : > { %986 = vmatpush3.msra.mxu0 %v373_v14  ;;  %1050 = vmatpush3.msra.mxu1 %v373_v14 }
  0x23   : > { %242 = vperm.xlu1 %1062, %v167_v17   ;;  %194 = vperm.xlu0 %1061, %v151_v18  }
  0x27   : > { %245 = vperm.xlu1 %1062, %v168_v19   ;;  %197 = vperm.xlu0 %1061, %v152_v20  }
  0x2b   : > { %248 = vperm.xlu1 %1062, %v169_v21   ;;  %200 = vperm.xlu0 %1061, %v153_v22  }
  0x2f   : > { %251 = vperm.xlu1 %1062, %v170_v23   ;;  %203 = vperm.xlu0 %1061, %v154_v24  }
  0x33   : > { %254 = vperm.xlu1 %1062, %v171_v25   ;;  %206 = vperm.xlu0 %1061, %v155_v26  }
  0x37   : > { %257 = vperm.xlu1 %1062, %v172_v27   ;;  %209 = vperm.xlu0 %1061, %v156_v28  }
  0x3b   : > { %260 = vperm.xlu1 %1062, %v173_v29   ;;  %212 = vperm.xlu0 %1061, %v157_v30  }
  0x3f   : > { %263 = vperm.xlu1 %1062, %v174_v31   ;;  %215 = vperm.xlu0 %1061, %v158_v32  }
  0x43   : > { %266 = vperm.xlu1 %1062, %v175_v33   ;;  %218 = vperm.xlu0 %1061, %v159_v34  }
  0x47   : > { %269 = vperm.xlu1 %1062, %v176_v35   ;;  %221 = vperm.xlu0 %1061, %v160_v36  }
  0x4b   : > { %272 = vperm.xlu1 %1062, %v177_v37   ;;  %224 = vperm.xlu0 %1061, %v161_v38  }
  0x4f   : > { %275 = vperm.xlu1 %1062, %v178_v39   ;;  %227 = vperm.xlu0 %1061, %v162_v40  }
  0x8e   : > { %v186_v43 = vpop.permute.xlu1 %185  ;;  %v183_v44 = vpop.permute.xlu0 %182 }
  0x8f   : > { %vm278_vm1 = vcmp.eq.s32.totalorder %v186_v43, %v1162_v42  ;;  %vm277_vm2 = vcmp.eq.s32.totalorder %v183_v44, %v1162_v42 }
  0x90   : > { %v866_v46 = vsel %vm278_vm1, 1.0, %v1072_v45  ;;  %v865_v47 = vsel %vm277_vm2, 1.0, %v1072_v45 }
  0x91   : > { %987 = vmatprep.mubr.msk.f32.mxu0 %vm381_vm0, %v865_v47 }
  0x92   : > { %v234_v48 = vpop.permute.xlu1 %233  ;;  %988 = vmatmul.mubr.msk.f32.vlgmr.msra.gmra.mxu0 %vm381_vm0, %v866_v46  ;;  %v231_v49 = vpop.permute.xlu0 %230 }
  0x93   : > { %vm294_vm3 = vcmp.eq.s32.totalorder %v234_v48, %v1162_v42  ;;  %vm293_vm4 = vcmp.eq.s32.totalorder %v231_v49, %v1162_v42 }
  0x94   : > { %v882_v50 = vsel %vm294_vm3, 1.0, %v1072_v45  ;;  %v881_v51 = vsel %vm293_vm4, 1.0, %v1072_v45 }
  0x95   : > { %1011 = vmatprep.mubr.msk.f32.mxu1 %vm381_vm0, %v881_v51 }
  0x96   : > { %v237_v52 = vpop.permute.xlu1 %236  ;;  %1012 = vmatmul.mubr.msk.f32.vlgmr.msra.gmra.mxu1 %vm381_vm0, %v882_v50  ;;  %v189_v53 = vpop.permute.xlu0 %188 }
  0x97   : > { %vm295_vm5 = vcmp.eq.s32.totalorder %v237_v52, %v1162_v42  ;;  %vm279_vm6 = vcmp.eq.s32.totalorder %v189_v53, %v1162_v42 }
  0x98   : > { %v883_v54 = vsel %vm295_vm5, 1.0, %v1072_v45  ;;  %v867_v55 = vsel %vm279_vm6, 1.0, %v1072_v45 }
  0x99   : > { %990 = vmatprep.mubr.msk.f32.mxu0 %vm381_vm0, %v867_v55  ;;  %1014 = vmatprep.mubr.msk.f32.mxu1 %vm381_vm0, %v883_v54 }
  0x9a   : > { %v240_v56 = vpop.permute.xlu1 %239  ;;  %v192_v57 = vpop.permute.xlu0 %191 }
  0x9b   : > { %vm296_vm7 = vcmp.eq.s32.totalorder %v240_v56, %v1162_v42  ;;  %vm280_vm8 = vcmp.eq.s32.totalorder %v192_v57, %v1162_v42 }
  0x9c   : > { %v884_v58 = vsel %vm296_vm7, 1.0, %v1072_v45  ;;  %v868_v59 = vsel %vm280_vm8, 1.0, %v1072_v45 }
  0x9d   : > { %991 = vmatmul.mubr.msk.f32.gmra.mxu0 %vm381_vm0, %v868_v59  ;;  %1015 = vmatmul.mubr.msk.f32.gmra.mxu1 %vm381_vm0, %v884_v58 }
  0x9e   : > { %v243_v60 = vpop.permute.xlu1 %242  ;;  %v195_v61 = vpop.permute.xlu0 %194 }
  0x9f   : > { %vm297_vm9 = vcmp.eq.s32.totalorder %v243_v60, %v1162_v42  ;;  %vm281_vm10 = vcmp.eq.s32.totalorder %v195_v61, %v1162_v42 }
  0xa0   : > { %v885_v62 = vsel %vm297_vm9, 1.0, %v1072_v45  ;;  %v869_v63 = vsel %vm281_vm10, 1.0, %v1072_v45 }
  0xa1   : > { %993 = vmatprep.mubr.msk.f32.mxu0 %vm381_vm0, %v869_v63  ;;  %1017 = vmatprep.mubr.msk.f32.mxu1 %vm381_vm0, %v885_v62 }
  0xa2   : > { %v246_v0 = vpop.permute.xlu1 %245  ;;  %v198_v1 = vpop.permute.xlu0 %197 }
  0xa3   : > { %vm298_vm11 = vcmp.eq.s32.totalorder %v246_v0, %v1162_v42  ;;  %vm282_vm12 = vcmp.eq.s32.totalorder %v198_v1, %v1162_v42 }
  0xa4   : > { %v886_v2 = vsel %vm298_vm11, 1.0, %v1072_v45  ;;  %v870_v3 = vsel %vm282_vm12, 1.0, %v1072_v45 }
  0xa5   : > { %994 = vmatmul.mubr.msk.f32.gmra.mxu0 %vm381_vm0, %v870_v3  ;;  %1018 = vmatmul.mubr.msk.f32.gmra.mxu1 %vm381_vm0, %v886_v2 }
  0xa6   : > { %v249_v4 = vpop.permute.xlu1 %248  ;;  %v201_v5 = vpop.permute.xlu0 %200 }
  0xa7   : > { %vm299_vm13 = vcmp.eq.s32.totalorder %v249_v4, %v1162_v42  ;;  %vm283_vm14 = vcmp.eq.s32.totalorder %v201_v5, %v1162_v42 }
  0xa8   : > { %v887_v6 = vsel %vm299_vm13, 1.0, %v1072_v45  ;;  %v871_v7 = vsel %vm283_vm14, 1.0, %v1072_v45 }
  0xa9   : > { %996 = vmatprep.mubr.msk.f32.mxu0 %vm381_vm0, %v871_v7  ;;  %1020 = vmatprep.mubr.msk.f32.mxu1 %vm381_vm0, %v887_v6 }
  0xaa   : > { %v252_v8 = vpop.permute.xlu1 %251  ;;  %v204_v9 = vpop.permute.xlu0 %203 }
  0xab   : > { %vm300_vm15 = vcmp.eq.s32.totalorder %v252_v8, %v1162_v42  ;;  %vm284_vm1 = vcmp.eq.s32.totalorder %v204_v9, %v1162_v42 }
  0xac   : > { %v888_v10 = vsel %vm300_vm15, 1.0, %v1072_v45  ;;  %v872_v11 = vsel %vm284_vm1, 1.0, %v1072_v45 }
  0xad   : > { %997 = vmatmul.mubr.msk.f32.gmra.mxu0 %vm381_vm0, %v872_v11  ;;  %1021 = vmatmul.mubr.msk.f32.gmra.mxu1 %vm381_vm0, %v888_v10 }
  0xae   : > { %v255_v12 = vpop.permute.xlu1 %254  ;;  %v207_v13 = vpop.permute.xlu0 %206 }
  0xaf   : > { %vm301_vm2 = vcmp.eq.s32.totalorder %v255_v12, %v1162_v42  ;;  %vm285_vm3 = vcmp.eq.s32.totalorder %v207_v13, %v1162_v42 }
  0xb0   : > { %v889_v14 = vsel %vm301_vm2, 1.0, %v1072_v45  ;;  %v873_v15 = vsel %vm285_vm3, 1.0, %v1072_v45  ;;  %vm703_vm3 = vcmask 261120  }
  0xb1   : > { %999 = vmatprep.mubr.msk.f32.mxu0 %vm381_vm0, %v873_v15  ;;  %1023 = vmatprep.mubr.msk.f32.mxu1 %vm381_vm0, %v889_v14 }
  0xb2   : > { %v258_v16 = vpop.permute.xlu1 %257  ;;  %v210_v17 = vpop.permute.xlu0 %209 }
  0xb3   : > { %vm302_vm4 = vcmp.eq.s32.totalorder %v258_v16, %v1162_v42  ;;  %vm286_vm5 = vcmp.eq.s32.totalorder %v210_v17, %v1162_v42 }
  0xb4   : > { %v890_v18 = vsel %vm302_vm4, 1.0, %v1072_v45  ;;  %v874_v19 = vsel %vm286_vm5, 1.0, %v1072_v45 }
  0xb5   : > { %1000 = vmatmul.mubr.msk.f32.gmra.mxu0 %vm381_vm0, %v874_v19  ;;  %1024 = vmatmul.mubr.msk.f32.gmra.mxu1 %vm381_vm0, %v890_v18 }
  0xb6   : > { %v261_v20 = vpop.permute.xlu1 %260  ;;  %v213_v21 = vpop.permute.xlu0 %212 }
  0xb7   : > { %vm303_vm6 = vcmp.eq.s32.totalorder %v261_v20, %v1162_v42  ;;  %vm287_vm7 = vcmp.eq.s32.totalorder %v213_v21, %v1162_v42 }
  0xb8   : > { %v891_v22 = vsel %vm303_vm6, 1.0, %v1072_v45  ;;  %v875_v23 = vsel %vm287_vm7, 1.0, %v1072_v45 }
  0xb9   : > { %1002 = vmatprep.mubr.msk.f32.mxu0 %vm381_vm0, %v875_v23  ;;  %1026 = vmatprep.mubr.msk.f32.mxu1 %vm381_vm0, %v891_v22 }
  0xba   : > { %v264_v24 = vpop.permute.xlu1 %263  ;;  %v216_v25 = vpop.permute.xlu0 %215 }
  0xbb   : > { %vm304_vm8 = vcmp.eq.s32.totalorder %v264_v24, %v1162_v42  ;;  %vm288_vm9 = vcmp.eq.s32.totalorder %v216_v25, %v1162_v42 }
  0xbc   : > { %v892_v26 = vsel %vm304_vm8, 1.0, %v1072_v45  ;;  %v876_v27 = vsel %vm288_vm9, 1.0, %v1072_v45 }
  0xbd   : > { %1003 = vmatmul.mubr.msk.f32.gmra.mxu0 %vm381_vm0, %v876_v27  ;;  %1027 = vmatmul.mubr.msk.f32.gmra.mxu1 %vm381_vm0, %v892_v26 }
  0xbe   : > { %v267_v28 = vpop.permute.xlu1 %266  ;;  %v219_v29 = vpop.permute.xlu0 %218 }
  0xbf   : > { %vm305_vm10 = vcmp.eq.s32.totalorder %v267_v28, %v1162_v42  ;;  %vm289_vm11 = vcmp.eq.s32.totalorder %v219_v29, %v1162_v42 }
  0xc0   : > { %v893_v30 = vsel %vm305_vm10, 1.0, %v1072_v45  ;;  %v877_v31 = vsel %vm289_vm11, 1.0, %v1072_v45 }
  0xc1   : > { %1005 = vmatprep.mubr.msk.f32.mxu0 %vm381_vm0, %v877_v31  ;;  %1029 = vmatprep.mubr.msk.f32.mxu1 %vm381_vm0, %v893_v30 }
  0xc2   : > { %v270_v32 = vpop.permute.xlu1 %269  ;;  %v222_v33 = vpop.permute.xlu0 %221 }
  0xc3   : > { %vm306_vm12 = vcmp.eq.s32.totalorder %v270_v32, %v1162_v42  ;;  %vm290_vm13 = vcmp.eq.s32.totalorder %v222_v33, %v1162_v42 }
  0xc4   : > { %v894_v34 = vsel %vm306_vm12, 1.0, %v1072_v45  ;;  %v878_v35 = vsel %vm290_vm13, 1.0, %v1072_v45 }
  0xc5   : > { %1006 = vmatmul.mubr.msk.f32.gmra.mxu0 %vm381_vm0, %v878_v35  ;;  %1030 = vmatmul.mubr.msk.f32.gmra.mxu1 %vm381_vm0, %v894_v34 }
  0xc6   : > { %v273_v36 = vpop.permute.xlu1 %272  ;;  %v225_v37 = vpop.permute.xlu0 %224 }
  0xc7   : > { %vm307_vm14 = vcmp.eq.s32.totalorder %v273_v36, %v1162_v42  ;;  %vm291_vm15 = vcmp.eq.s32.totalorder %v225_v37, %v1162_v42 }
  0xc8   : > { %v895_v38 = vsel %vm307_vm14, 1.0, %v1072_v45  ;;  %v879_v39 = vsel %vm291_vm15, 1.0, %v1072_v45 }
  0xc9   : > { %1008 = vmatprep.mubr.msk.f32.mxu0 %vm381_vm0, %v879_v39  ;;  %1032 = vmatprep.mubr.msk.f32.mxu1 %vm381_vm0, %v895_v38 }
  0xca   : > { %v276_v40 = vpop.permute.xlu1 %275  ;;  %v228_v41 = vpop.permute.xlu0 %227 }
  0xcb   : > { %vm308_vm1 = vcmp.eq.s32.totalorder %v276_v40, %v1162_v42  ;;  %vm292_vm2 = vcmp.eq.s32.totalorder %v228_v41, %v1162_v42 }
  0xcc   : > { %v896_v43 = vsel %vm308_vm1, 1.0, %v1072_v45  ;;  %v880_v44 = vsel %vm292_vm2, 1.0, %v1072_v45 }
  0xcd   : > { %1009 = vmatmul.mubr.msk.f32.gmra.mxu0 %vm381_vm0, %v880_v44  ;;  %1033 = vmatmul.mubr.msk.f32.gmra.mxu1 %vm381_vm0, %v896_v43 }
 0x152   : > { %v989_v46 = vpop.f32.mrf.mxu0 }
 0x153   : > { %705 = vst.msk [vmem:[#allocation2 + $0x8] sm:$0xff] %vm703_vm3, %v989_v46 }
 0x154   : > { %v544_v47 = vpop.f32.mrf.mxu0 }
 0x155   : > { %704 = vst.msk [vmem:[#allocation2] sm:$0xff] %vm703_vm3, %v544_v47 }
 0x156   : > { %v1013_v48 = vpop.f32.mrf.mxu1 }
 0x157   : > { %721 = vst.msk [vmem:[#allocation2 + $0x88] sm:$0xff] %vm703_vm3, %v1013_v48 }
 0x158   : > { %v624_v42 = vpop.f32.mrf.mxu1 }
 0x159   : > { %720 = vst.msk [vmem:[#allocation2 + $0x80] sm:$0xff] %vm703_vm3, %v624_v42 }
 0x15a   : > { %v737_v45 = vld [vmem:[#allocation2 + $0x8] sm:$0xff] }
 0x15b   : > { %769 = vst.msk [vmem:[%s1268_s6 + $0x8] sm:$0xff] %vm703_vm3, %v737_v45 }
 0x15c   : > { %v736_v49 = vld [vmem:[#allocation2] sm:$0xff] }
 0x15d   : > { %768 = vst.msk [vmem:[%s1268_s6] sm:$0xff] %vm703_vm3, %v736_v49  ;;  %v992_v50 = vpop.f32.mrf.mxu0  ;;  %v1016_v51 = vpop.f32.mrf.mxu1 }
 0x15e   : > { %v753_v52 = vld [vmem:[#allocation2 + $0x88] sm:$0xff]  ;;  %707 = vst.msk [vmem:[#allocation2 + $0x18] sm:$0xff] %vm703_vm3, %v992_v50  ;;  %723 = vst.msk [vmem:[#allocation2 + $0x98] sm:$0xff] %vm703_vm3, %v1016_v51 }
 0x15f   : > { %785 = vst.msk [vmem:[%s1268_s6 + $0x88] sm:$0xff] %vm703_vm3, %v753_v52  ;;  %v554_v53 = vpop.f32.mrf.mxu0  ;;  %v634_v54 = vpop.f32.mrf.mxu1 }
 0x160   : > { %v752_v55 = vld [vmem:[#allocation2 + $0x80] sm:$0xff]  ;;  %706 = vst.msk [vmem:[#allocation2 + $0x10] sm:$0xff] %vm703_vm3, %v554_v53  ;;  %722 = vst.msk [vmem:[#allocation2 + $0x90] sm:$0xff] %vm703_vm3, %v634_v54 }
 0x161   : > { %784 = vst.msk [vmem:[%s1268_s6 + $0x80] sm:$0xff] %vm703_vm3, %v752_v55 }
 0x165   : > { %v739_v56 = vld [vmem:[#allocation2 + $0x18] sm:$0xff]  ;;  %v995_v58 = vpop.f32.mrf.mxu0  ;;  %v1019_v59 = vpop.f32.mrf.mxu1 }
 0x166   : > { %v755_v57 = vld [vmem:[#allocation2 + $0x98] sm:$0xff]  ;;  %771 = vst.msk [vmem:[%s1268_s6 + $0x18] sm:$0xff] %vm703_vm3, %v739_v56  ;;  %709 = vst.msk [vmem:[#allocation2 + $0x28] sm:$0xff] %vm703_vm3, %v995_v58 }
 0x167   : > { %787 = vst.msk [vmem:[%s1268_s6 + $0x98] sm:$0xff] %vm703_vm3, %v755_v57  ;;  %725 = vst.msk [vmem:[#allocation2 + $0xa8] sm:$0xff] %vm703_vm3, %v1019_v59  ;;  %v738_v60 = vld [vmem:[#allocation2 + $0x10] sm:$0xff]  ;;  %v564_v62 = vpop.f32.mrf.mxu0  ;;  %v644_v63 = vpop.f32.mrf.mxu1 }
 0x168   : > { %v754_v61 = vld [vmem:[#allocation2 + $0x90] sm:$0xff]  ;;  %770 = vst.msk [vmem:[%s1268_s6 + $0x10] sm:$0xff] %vm703_vm3, %v738_v60  ;;  %708 = vst.msk [vmem:[#allocation2 + $0x20] sm:$0xff] %vm703_vm3, %v564_v62 }
 0x169   : > { %786 = vst.msk [vmem:[%s1268_s6 + $0x90] sm:$0xff] %vm703_vm3, %v754_v61  ;;  %724 = vst.msk [vmem:[#allocation2 + $0xa0] sm:$0xff] %vm703_vm3, %v644_v63 }
 0x16d   : > { %v741_v0 = vld [vmem:[#allocation2 + $0x28] sm:$0xff]  ;;  %v998_v2 = vpop.f32.mrf.mxu0  ;;  %v1022_v3 = vpop.f32.mrf.mxu1 }
 0x16e   : > { %v757_v1 = vld [vmem:[#allocation2 + $0xa8] sm:$0xff]  ;;  %773 = vst.msk [vmem:[%s1268_s6 + $0x28] sm:$0xff] %vm703_vm3, %v741_v0  ;;  %711 = vst.msk [vmem:[#allocation2 + $0x38] sm:$0xff] %vm703_vm3, %v998_v2 }
 0x16f   : > { %789 = vst.msk [vmem:[%s1268_s6 + $0xa8] sm:$0xff] %vm703_vm3, %v757_v1  ;;  %727 = vst.msk [vmem:[#allocation2 + $0xb8] sm:$0xff] %vm703_vm3, %v1022_v3  ;;  %v740_v4 = vld [vmem:[#allocation2 + $0x20] sm:$0xff]  ;;  %v574_v6 = vpop.f32.mrf.mxu0  ;;  %v654_v7 = vpop.f32.mrf.mxu1 }
 0x170   : > { %v756_v5 = vld [vmem:[#allocation2 + $0xa0] sm:$0xff]  ;;  %772 = vst.msk [vmem:[%s1268_s6 + $0x20] sm:$0xff] %vm703_vm3, %v740_v4  ;;  %710 = vst.msk [vmem:[#allocation2 + $0x30] sm:$0xff] %vm703_vm3, %v574_v6 }
 0x171   : > { %788 = vst.msk [vmem:[%s1268_s6 + $0xa0] sm:$0xff] %vm703_vm3, %v756_v5  ;;  %726 = vst.msk [vmem:[#allocation2 + $0xb0] sm:$0xff] %vm703_vm3, %v654_v7 }
 0x175   : > { %v743_v8 = vld [vmem:[#allocation2 + $0x38] sm:$0xff]  ;;  %v1001_v10 = vpop.f32.mrf.mxu0  ;;  %v1025_v11 = vpop.f32.mrf.mxu1 }
 0x176   : > { %v759_v9 = vld [vmem:[#allocation2 + $0xb8] sm:$0xff]  ;;  %775 = vst.msk [vmem:[%s1268_s6 + $0x38] sm:$0xff] %vm703_vm3, %v743_v8  ;;  %713 = vst.msk [vmem:[#allocation2 + $0x48] sm:$0xff] %vm703_vm3, %v1001_v10 }
 0x177   : > { %791 = vst.msk [vmem:[%s1268_s6 + $0xb8] sm:$0xff] %vm703_vm3, %v759_v9  ;;  %729 = vst.msk [vmem:[#allocation2 + $0xc8] sm:$0xff] %vm703_vm3, %v1025_v11  ;;  %v742_v12 = vld [vmem:[#allocation2 + $0x30] sm:$0xff]  ;;  %v584_v14 = vpop.f32.mrf.mxu0  ;;  %v664_v15 = vpop.f32.mrf.mxu1 }
 0x178   : > { %v758_v13 = vld [vmem:[#allocation2 + $0xb0] sm:$0xff]  ;;  %774 = vst.msk [vmem:[%s1268_s6 + $0x30] sm:$0xff] %vm703_vm3, %v742_v12  ;;  %712 = vst.msk [vmem:[#allocation2 + $0x40] sm:$0xff] %vm703_vm3, %v584_v14 }
 0x179   : > { %790 = vst.msk [vmem:[%s1268_s6 + $0xb0] sm:$0xff] %vm703_vm3, %v758_v13  ;;  %728 = vst.msk [vmem:[#allocation2 + $0xc0] sm:$0xff] %vm703_vm3, %v664_v15 }
 0x17d   : > { %v745_v16 = vld [vmem:[#allocation2 + $0x48] sm:$0xff]  ;;  %v1004_v18 = vpop.f32.mrf.mxu0  ;;  %v1028_v19 = vpop.f32.mrf.mxu1 }
 0x17e   : > { %v761_v17 = vld [vmem:[#allocation2 + $0xc8] sm:$0xff]  ;;  %777 = vst.msk [vmem:[%s1268_s6 + $0x48] sm:$0xff] %vm703_vm3, %v745_v16  ;;  %715 = vst.msk [vmem:[#allocation2 + $0x58] sm:$0xff] %vm703_vm3, %v1004_v18 }
 0x17f   : > { %793 = vst.msk [vmem:[%s1268_s6 + $0xc8] sm:$0xff] %vm703_vm3, %v761_v17  ;;  %731 = vst.msk [vmem:[#allocation2 + $0xd8] sm:$0xff] %vm703_vm3, %v1028_v19  ;;  %v744_v20 = vld [vmem:[#allocation2 + $0x40] sm:$0xff]  ;;  %v594_v22 = vpop.f32.mrf.mxu0  ;;  %v674_v23 = vpop.f32.mrf.mxu1 }
 0x180   : > { %v760_v21 = vld [vmem:[#allocation2 + $0xc0] sm:$0xff]  ;;  %776 = vst.msk [vmem:[%s1268_s6 + $0x40] sm:$0xff] %vm703_vm3, %v744_v20  ;;  %714 = vst.msk [vmem:[#allocation2 + $0x50] sm:$0xff] %vm703_vm3, %v594_v22 }
 0x181   : > { %792 = vst.msk [vmem:[%s1268_s6 + $0xc0] sm:$0xff] %vm703_vm3, %v760_v21  ;;  %730 = vst.msk [vmem:[#allocation2 + $0xd0] sm:$0xff] %vm703_vm3, %v674_v23 }
 0x185   : > { %v747_v24 = vld [vmem:[#allocation2 + $0x58] sm:$0xff]  ;;  %v1007_v26 = vpop.f32.mrf.mxu0  ;;  %v1031_v27 = vpop.f32.mrf.mxu1 }
 0x186   : > { %v763_v25 = vld [vmem:[#allocation2 + $0xd8] sm:$0xff]  ;;  %779 = vst.msk [vmem:[%s1268_s6 + $0x58] sm:$0xff] %vm703_vm3, %v747_v24  ;;  %717 = vst.msk [vmem:[#allocation2 + $0x68] sm:$0xff] %vm703_vm3, %v1007_v26 }
 0x187   : > { %795 = vst.msk [vmem:[%s1268_s6 + $0xd8] sm:$0xff] %vm703_vm3, %v763_v25  ;;  %733 = vst.msk [vmem:[#allocation2 + $0xe8] sm:$0xff] %vm703_vm3, %v1031_v27  ;;  %v746_v28 = vld [vmem:[#allocation2 + $0x50] sm:$0xff]  ;;  %v604_v30 = vpop.f32.mrf.mxu0  ;;  %v684_v31 = vpop.f32.mrf.mxu1 }
 0x188   : > { %v762_v29 = vld [vmem:[#allocation2 + $0xd0] sm:$0xff]  ;;  %778 = vst.msk [vmem:[%s1268_s6 + $0x50] sm:$0xff] %vm703_vm3, %v746_v28  ;;  %716 = vst.msk [vmem:[#allocation2 + $0x60] sm:$0xff] %vm703_vm3, %v604_v30 }
 0x189   : > { %794 = vst.msk [vmem:[%s1268_s6 + $0xd0] sm:$0xff] %vm703_vm3, %v762_v29  ;;  %732 = vst.msk [vmem:[#allocation2 + $0xe0] sm:$0xff] %vm703_vm3, %v684_v31 }
 0x18d   : > { %v749_v32 = vld [vmem:[#allocation2 + $0x68] sm:$0xff]  ;;  %v1010_v34 = vpop.f32.mrf.mxu0  ;;  %v1034_v35 = vpop.f32.mrf.mxu1 }
 0x18e   : > { %v765_v33 = vld [vmem:[#allocation2 + $0xe8] sm:$0xff]  ;;  %781 = vst.msk [vmem:[%s1268_s6 + $0x68] sm:$0xff] %vm703_vm3, %v749_v32  ;;  %719 = vst.msk [vmem:[#allocation2 + $0x78] sm:$0xff] %vm703_vm3, %v1010_v34 }
 0x18f   : > { %797 = vst.msk [vmem:[%s1268_s6 + $0xe8] sm:$0xff] %vm703_vm3, %v765_v33  ;;  %735 = vst.msk [vmem:[#allocation2 + $0xf8] sm:$0xff] %vm703_vm3, %v1034_v35  ;;  %v748_v36 = vld [vmem:[#allocation2 + $0x60] sm:$0xff]  ;;  %v614_v38 = vpop.f32.mrf.mxu0  ;;  %v694_v39 = vpop.f32.mrf.mxu1 }
 0x190   : > { %v764_v37 = vld [vmem:[#allocation2 + $0xe0] sm:$0xff]  ;;  %780 = vst.msk [vmem:[%s1268_s6 + $0x60] sm:$0xff] %vm703_vm3, %v748_v36  ;;  %718 = vst.msk [vmem:[#allocation2 + $0x70] sm:$0xff] %vm703_vm3, %v614_v38 }
 0x191   : > { %796 = vst.msk [vmem:[%s1268_s6 + $0xe0] sm:$0xff] %vm703_vm3, %v764_v37  ;;  %734 = vst.msk [vmem:[#allocation2 + $0xf0] sm:$0xff] %vm703_vm3, %v694_v39 }
 0x195   : > { %v751_v40 = vld [vmem:[#allocation2 + $0x78] sm:$0xff] }
 0x196   : > { %v767_v41 = vld [vmem:[#allocation2 + $0xf8] sm:$0xff]  ;;  %783 = vst.msk [vmem:[%s1268_s6 + $0x78] sm:$0xff] %vm703_vm3, %v751_v40 }
 0x197   : > { %799 = vst.msk [vmem:[%s1268_s6 + $0xf8] sm:$0xff] %vm703_vm3, %v767_v41  ;;  %v750_v43 = vld [vmem:[#allocation2 + $0x70] sm:$0xff] }
 0x198   : > { %v766_v44 = vld [vmem:[#allocation2 + $0xf0] sm:$0xff]  ;;  %782 = vst.msk [vmem:[%s1268_s6 + $0x70] sm:$0xff] %vm703_vm3, %v750_v43 }
 0x199   : > { %798 = vst.msk [vmem:[%s1268_s6 + $0xf0] sm:$0xff] %vm703_vm3, %v766_v44 }
 0x19a PF: > { %s12_s9 = sadd.s32 1, %s1069_s9  }
 0x19b   : > { %p9_p4 = scmp.ge.s32.totalorder %s12_s9, 4  }
 0x19d   :  { %11 = sbr.rel (!%p9_p4) target bundleno = 1 (0x1), region = 58 }

</bundles_post_ra>
